<compile_context>
chip_gen: v6e
topology: v6e:2x2x1
jax: 0.10.0
libtpu: 0.0.40
codegen_flags: <defaults>
</compile_context>

<pallas_src>
import functools

import jax
import jax.numpy as jnp
from jax.experimental import pallas as pl
from jax.experimental.pallas import tpu as pltpu


def linear_kernel(x_ref, w_ref, b_ref, o_ref, acc_ref):
    k = pl.program_id(2)

    @pl.when(k == 0)
    def _():
        acc_ref[...] = jnp.zeros_like(acc_ref)

    acc_ref[...] += jnp.dot(
        x_ref[...], w_ref[...], preferred_element_type=jnp.float32
    )

    @pl.when(k == pl.num_programs(2) - 1)
    def _():
        # Bias added exactly once, on the f32 accumulator, then cast on store.
        o_ref[...] = (acc_ref[...] + b_ref[...]).astype(o_ref.dtype)


def _round_up(v: int, m: int) -> int:
    return ((v + m - 1) // m) * m


@functools.partial(jax.jit, static_argnames=("tm", "tn", "tk"))
def my_linear(x: jax.Array, w: jax.Array, b: jax.Array,
              *, tm: int = 128, tn: int = 128, tk: int = 128) -> jax.Array:
    M, K = x.shape
    K2, N = w.shape
    assert K == K2 and b.shape == (N,)

    # Pad every axis up to a tile multiple so blocks are (8,128)-aligned and
    # the output store is lane-dense (unmasked vst). Zero padding along K
    # contributes nothing to the matmul; padded M/N rows/cols are sliced off.
    Mp, Kp, Np = _round_up(M, tm), _round_up(K, tk), _round_up(N, tn)
    x_p = jnp.pad(x, ((0, Mp - M), (0, Kp - K)))
    w_p = jnp.pad(w, ((0, Kp - K), (0, Np - N)))
    b_p = jnp.pad(b, (0, Np - N)).reshape(1, Np)

    grid = (Mp // tm, Np // tn, Kp // tk)

    out_p = pl.pallas_call(
        linear_kernel,
        out_shape=jax.ShapeDtypeStruct((Mp, Np), x.dtype),
        grid_spec=pltpu.PrefetchScalarGridSpec(
            num_scalar_prefetch=0,
            grid=grid,
            in_specs=[
                pl.BlockSpec((tm, tk), lambda i, j, k: (i, k)),   # x tile
                pl.BlockSpec((tk, tn), lambda i, j, k: (k, j)),   # w tile
                pl.BlockSpec((1, tn), lambda i, j, k: (0, j)),    # bias tile
            ],
            out_specs=pl.BlockSpec((tm, tn), lambda i, j, k: (i, j)),
            scratch_shapes=[pltpu.VMEM((tm, tn), jnp.float32)],
        ),
        compiler_params=pltpu.CompilerParams(
            dimension_semantics=("parallel", "parallel", "arbitrary"),
        ),
    )(x_p, w_p, b_p)

    return out_p[:M, :N]


if __name__ == "__main__":
    key = jax.random.PRNGKey(0)
    kw, kb, kx = jax.random.split(key, 3)

    # --- Check 1: the literal MyLinear example (input_dim=3, output_dim=2) ---
    input_dim, output_dim = 3, 2
    w = jax.random.normal(kw, (input_dim, output_dim), dtype=jnp.float32)
    b = jax.random.normal(kb, (output_dim,), dtype=jnp.float32)
    x = jnp.array([[1., 1., 1.],
                   [2., 2., 2.],
                   [3., 3., 3.],
                   [4., 4., 4.]], dtype=jnp.float32)

    y = my_linear(x, w, b)
    jax.block_until_ready(y)
    y_ref = x @ w + b
    assert y.shape == y_ref.shape and y.dtype == x.dtype
    assert jnp.allclose(y, y_ref, atol=1e-5, rtol=1e-5)

    # --- Check 2: multi-tile grid (exercises K accumulation + bias epilogue) ---
    M2, K2, N2 = 256, 384, 256          # grid = (2, 2, 3) with 128-tiles
    kx2, kw2, kb2 = jax.random.split(kx, 3)
    x2 = jax.random.normal(kx2, (M2, K2), dtype=jnp.float32)
    w2 = jax.random.normal(kw2, (K2, N2), dtype=jnp.float32)
    b2 = jax.random.normal(kb2, (N2,), dtype=jnp.float32)

    y2 = my_linear(x2, w2, b2)
    jax.block_until_ready(y2)
    y2_ref = x2 @ w2 + b2
    assert jnp.allclose(y2, y2_ref, atol=1e-3, rtol=1e-3)

    print("KERNEL_OK")
</pallas_src>

<mosaic_0001>
module attributes {stable_mosaic.version = 11 : i64} {
  func.func @linear_kernel(%arg0: i32, %arg1: i32, %arg2: i32, %arg3: memref<128x128xf32, #tpu.memory_space<vmem>>, %arg4: memref<128x128xf32, #tpu.memory_space<vmem>>, %arg5: memref<1x128xf32, #tpu.memory_space<vmem>>, %arg6: memref<128x128xf32, #tpu.memory_space<vmem>>, %arg7: memref<128x128xf32, #tpu.memory_space<vmem>>) attributes {dimension_semantics = [#tpu.dimension_semantics<parallel>, #tpu.dimension_semantics<parallel>, #tpu.dimension_semantics<arbitrary>], iteration_bounds = array<i64: 1, 1, 1>, scalar_prefetch = 0 : i64, scratch_operands = 1 : i64, tpu.core_type = #tpu.core_type<tc>, window_params = [{transform_indices = @transform_0, window_bounds = array<i64: 128, 128>}, {transform_indices = @transform_1, window_bounds = array<i64: 128, 128>}, {transform_indices = @transform_2, window_bounds = array<i64: 1, 128>}, {transform_indices = @transform_3, window_bounds = array<i64: 128, 128>}]} {
    %c0_i32 = arith.constant 0 : i32
    %0 = arith.cmpi eq, %arg2, %c0_i32 : i32
    %1 = arith.extui %0 : i1 to i32
    %c0_i32_0 = arith.constant 0 : i32
    %2 = arith.cmpi ne, %1, %c0_i32_0 : i32
    scf.if %2 {
      %cst_10 = arith.constant 0.000000e+00 : f32
      %12 = vector.broadcast %cst_10 : f32 to vector<128x128xf32>
      %c0_11 = arith.constant 0 : index
      %c0_12 = arith.constant 0 : index
      %13 = vector.load %arg7[%c0_11, %c0_12] : memref<128x128xf32, #tpu.memory_space<vmem>>, vector<128x128xf32>
      tpu.vector_store %arg7[%c0_11, %c0_12], %12 {strides = array<i32>} : memref<128x128xf32, #tpu.memory_space<vmem>>, vector<128x128xf32>,
    } else {
    }
    %c0 = arith.constant 0 : index
    %c0_1 = arith.constant 0 : index
    %3 = vector.load %arg7[%c0, %c0_1] : memref<128x128xf32, #tpu.memory_space<vmem>>, vector<128x128xf32>
    %c0_2 = arith.constant 0 : index
    %c0_3 = arith.constant 0 : index
    %4 = vector.load %arg3[%c0_2, %c0_3] : memref<128x128xf32, #tpu.memory_space<vmem>>, vector<128x128xf32>
    %c0_4 = arith.constant 0 : index
    %c0_5 = arith.constant 0 : index
    %5 = vector.load %arg4[%c0_4, %c0_5] : memref<128x128xf32, #tpu.memory_space<vmem>>, vector<128x128xf32>
    %cst = arith.constant dense<0.000000e+00> : vector<128x128xf32>
    %6 = tpu.matmul %4, %5, %cst {dimension_numbers = #tpu.dot_dimension_numbers<[1], [0], [0], [1], [0, 0, 1, 1], [], []>} : vector<128x128xf32>, vector<128x128xf32>, vector<128x128xf32> -> vector<128x128xf32>
    %7 = arith.addf %3, %6 : vector<128x128xf32>
    %c0_6 = arith.constant 0 : index
    %c0_7 = arith.constant 0 : index
    %8 = vector.load %arg7[%c0_6, %c0_7] : memref<128x128xf32, #tpu.memory_space<vmem>>, vector<128x128xf32>
    tpu.vector_store %arg7[%c0_6, %c0_7], %7 {strides = array<i32>} : memref<128x128xf32, #tpu.memory_space<vmem>>, vector<128x128xf32>,
    %c0_i32_8 = arith.constant 0 : i32
    %9 = arith.cmpi eq, %arg2, %c0_i32_8 : i32
    %10 = arith.extui %9 : i1 to i32
    %c0_i32_9 = arith.constant 0 : i32
    %11 = arith.cmpi ne, %10, %c0_i32_9 : i32
    scf.if %11 {
      %c0_10 = arith.constant 0 : index
      %c0_11 = arith.constant 0 : index
      %12 = vector.load %arg7[%c0_10, %c0_11] : memref<128x128xf32, #tpu.memory_space<vmem>>, vector<128x128xf32>
      %c0_12 = arith.constant 0 : index
      %c0_13 = arith.constant 0 : index
      %13 = vector.load %arg5[%c0_12, %c0_13] : memref<1x128xf32, #tpu.memory_space<vmem>>, vector<1x128xf32>
      %14 = vector.broadcast %13 : vector<1x128xf32> to vector<128x128xf32>
      %15 = arith.addf %12, %14 : vector<128x128xf32>
      %c0_14 = arith.constant 0 : index
      %c0_15 = arith.constant 0 : index
      %16 = vector.load %arg6[%c0_14, %c0_15] : memref<128x128xf32, #tpu.memory_space<vmem>>, vector<128x128xf32>
      tpu.vector_store %arg6[%c0_14, %c0_15], %15 {strides = array<i32>} : memref<128x128xf32, #tpu.memory_space<vmem>>, vector<128x128xf32>,
    } else {
    }
    return
  }
  func.func @transform_0(%arg0: i32, %arg1: i32, %arg2: i32) -> (i32, i32) {
    %c0_i32 = arith.constant 0 : i32
    return %arg0, %arg2 : i32, i32
  }
  func.func @transform_1(%arg0: i32, %arg1: i32, %arg2: i32) -> (i32, i32) {
    %c0_i32 = arith.constant 0 : i32
    return %arg2, %arg1 : i32, i32
  }
  func.func @transform_2(%arg0: i32, %arg1: i32, %arg2: i32) -> (i32, i32) {
    %c0_i32 = arith.constant 0 : i32
    %c0_i32_0 = arith.constant 0 : i32
    return %c0_i32, %arg1 : i32, i32
  }
  func.func @transform_3(%arg0: i32, %arg1: i32, %arg2: i32) -> (i32, i32) {
    %c0_i32 = arith.constant 0 : i32
    return %arg0, %arg1 : i32, i32
  }
}

</mosaic_0001>

<bundles_post_ra>
// kernel: my_linear.1
= control target key start
LH: loop header
LB: loop body
LE: loop exit
PB: predicated region body
PF: predicated region fallthrough
CT: control target
= control target key end

     0   :  { %s609_s1 = inlined_call_operand.vmem [shape: f32[128,128], index: 1, kind: input, shape index: {}]   ;;  %s610_s0 = inlined_call_operand.vmem [shape: f32[128,128], index: 0, kind: input, shape index: {}]   ;;  %s611_s2 = inlined_call_operand.vmem [shape: f32[1,128], index: 2, kind: input, shape index: {}]   ;;  %s612_s3 = inlined_call_operand.vmem [shape: f32[128,128], index: 3, kind: output, shape index: {}]  }
   0x1   :  { %v81_v0 = vld [vmem:[%s609_s1 + $0x78] sm:$0xff]  ;;  %v80_v1 = vld [vmem:[%s609_s1 + $0x70] sm:$0xff]  ;;  %v79_v2 = vld [vmem:[%s609_s1 + $0x68] sm:$0xff] }
   0x2   :  { %354 = vmatprep.subr.mxu0 %v81_v0  ;;  %410 = vmatprep.subr.mxu1 %v81_v0  ;;  %v78_v3 = vld [vmem:[%s609_s1 + $0x60] sm:$0xff]  ;;  %v77_v4 = vld [vmem:[%s609_s1 + $0x58] sm:$0xff]  ;;  %v76_v5 = vld [vmem:[%s609_s1 + $0x50] sm:$0xff] }
   0x3   :  { %355 = vmatpush3.msra.mxu0 %v81_v0  ;;  %426 = vmatpush3.msra.mxu1 %v81_v0  ;;  %v75_v6 = vld [vmem:[%s609_s1 + $0x48] sm:$0xff]  ;;  %v74_v7 = vld [vmem:[%s609_s1 + $0x40] sm:$0xff]  ;;  %v73_v8 = vld [vmem:[%s609_s1 + $0x38] sm:$0xff] }
   0x4   :  { %356 = vmatprep.subr.mxu0 %v80_v1  ;;  %411 = vmatprep.subr.mxu1 %v80_v1  ;;  %v72_v9 = vld [vmem:[%s609_s1 + $0x30] sm:$0xff]  ;;  %v71_v10 = vld [vmem:[%s609_s1 + $0x28] sm:$0xff]  ;;  %v70_v11 = vld [vmem:[%s609_s1 + $0x20] sm:$0xff] }
   0x5   :  { %357 = vmatpush3.msra.mxu0 %v80_v1  ;;  %427 = vmatpush3.msra.mxu1 %v80_v1  ;;  %v69_v12 = vld [vmem:[%s609_s1 + $0x18] sm:$0xff]  ;;  %v68_v13 = vld [vmem:[%s609_s1 + $0x10] sm:$0xff]  ;;  %v67_v14 = vld [vmem:[%s609_s1 + $0x8] sm:$0xff] }
   0x6   :  { %358 = vmatprep.subr.mxu0 %v79_v2  ;;  %412 = vmatprep.subr.mxu1 %v79_v2  ;;  %v66_v15 = vld [vmem:[%s609_s1] sm:$0xff]  ;;  %v51_v18 = vld [vmem:[%s610_s0 + $0x8] sm:$0xff]  ;;  %v52_v20 = vld [vmem:[%s610_s0 + $0x10] sm:$0xff] }
   0x7   :  { %359 = vmatpush3.msra.mxu0 %v79_v2  ;;  %428 = vmatpush3.msra.mxu1 %v79_v2  ;;  %v50_v16 = vld [vmem:[%s610_s0] sm:$0xff]  ;;  %v59_v19 = vld [vmem:[%s610_s0 + $0x48] sm:$0xff]  ;;  %v60_v21 = vld [vmem:[%s610_s0 + $0x50] sm:$0xff] }
   0x8   :  { %360 = vmatprep.subr.mxu0 %v78_v3  ;;  %413 = vmatprep.subr.mxu1 %v78_v3  ;;  %v58_v17 = vld [vmem:[%s610_s0 + $0x40] sm:$0xff]  ;;  %v53_v22 = vld [vmem:[%s610_s0 + $0x18] sm:$0xff]  ;;  %v55_v26 = vld [vmem:[%s610_s0 + $0x28] sm:$0xff] }
   0x9   :  { %361 = vmatpush3.msra.mxu0 %v78_v3  ;;  %429 = vmatpush3.msra.mxu1 %v78_v3  ;;  %v61_v23 = vld [vmem:[%s610_s0 + $0x58] sm:$0xff]  ;;  %v54_v24 = vld [vmem:[%s610_s0 + $0x20] sm:$0xff]  ;;  %v63_v27 = vld [vmem:[%s610_s0 + $0x68] sm:$0xff] }
   0xa   :  { %362 = vmatprep.subr.mxu0 %v77_v4  ;;  %414 = vmatprep.subr.mxu1 %v77_v4  ;;  %v62_v25 = vld [vmem:[%s610_s0 + $0x60] sm:$0xff]  ;;  %v56_v28 = vld [vmem:[%s610_s0 + $0x30] sm:$0xff]  ;;  %v57_v30 = vld [vmem:[%s610_s0 + $0x38] sm:$0xff] }
   0xb   :  { %363 = vmatpush3.msra.mxu0 %v77_v4  ;;  %430 = vmatpush3.msra.mxu1 %v77_v4  ;;  %v64_v29 = vld [vmem:[%s610_s0 + $0x70] sm:$0xff]  ;;  %v65_v31 = vld [vmem:[%s610_s0 + $0x78] sm:$0xff]  ;;  %v321_v32 = vld [vmem:[%s611_s2] ss:$0 sm:$0xff] }
   0xc   :  { %364 = vmatprep.subr.mxu0 %v76_v5  ;;  %415 = vmatprep.subr.mxu1 %v76_v5 }
   0xd   :  { %365 = vmatpush3.msra.mxu0 %v76_v5  ;;  %431 = vmatpush3.msra.mxu1 %v76_v5 }
   0xe   :  { %366 = vmatprep.subr.mxu0 %v75_v6  ;;  %416 = vmatprep.subr.mxu1 %v75_v6 }
   0xf   :  { %367 = vmatpush3.msra.mxu0 %v75_v6  ;;  %432 = vmatpush3.msra.mxu1 %v75_v6 }
  0x10   :  { %368 = vmatprep.subr.mxu0 %v74_v7  ;;  %417 = vmatprep.subr.mxu1 %v74_v7 }
  0x11   :  { %369 = vmatpush3.msra.mxu0 %v74_v7  ;;  %433 = vmatpush3.msra.mxu1 %v74_v7 }
  0x12   :  { %370 = vmatprep.subr.mxu0 %v73_v8  ;;  %418 = vmatprep.subr.mxu1 %v73_v8 }
  0x13   :  { %371 = vmatpush3.msra.mxu0 %v73_v8  ;;  %434 = vmatpush3.msra.mxu1 %v73_v8 }
  0x14   :  { %372 = vmatprep.subr.mxu0 %v72_v9  ;;  %419 = vmatprep.subr.mxu1 %v72_v9 }
  0x15   :  { %373 = vmatpush3.msra.mxu0 %v72_v9  ;;  %435 = vmatpush3.msra.mxu1 %v72_v9 }
  0x16   :  { %374 = vmatprep.subr.mxu0 %v71_v10  ;;  %420 = vmatprep.subr.mxu1 %v71_v10 }
  0x17   :  { %375 = vmatpush3.msra.mxu0 %v71_v10  ;;  %436 = vmatpush3.msra.mxu1 %v71_v10 }
  0x18   :  { %376 = vmatprep.subr.mxu0 %v70_v11  ;;  %421 = vmatprep.subr.mxu1 %v70_v11 }
  0x19   :  { %377 = vmatpush3.msra.mxu0 %v70_v11  ;;  %437 = vmatpush3.msra.mxu1 %v70_v11 }
  0x1a   :  { %378 = vmatprep.subr.mxu0 %v69_v12  ;;  %422 = vmatprep.subr.mxu1 %v69_v12 }
  0x1b   :  { %379 = vmatpush3.msra.mxu0 %v69_v12  ;;  %438 = vmatpush3.msra.mxu1 %v69_v12 }
  0x1c   :  { %380 = vmatprep.subr.mxu0 %v68_v13  ;;  %423 = vmatprep.subr.mxu1 %v68_v13 }
  0x1d   :  { %381 = vmatpush3.msra.mxu0 %v68_v13  ;;  %439 = vmatpush3.msra.mxu1 %v68_v13 }
  0x1e   :  { %382 = vmatprep.subr.mxu0 %v67_v14  ;;  %424 = vmatprep.subr.mxu1 %v67_v14 }
  0x1f   :  { %383 = vmatpush3.msra.mxu0 %v67_v14  ;;  %440 = vmatpush3.msra.mxu1 %v67_v14 }
  0x20   :  { %384 = vmatprep.subr.mxu0 %v66_v15  ;;  %425 = vmatprep.subr.mxu1 %v66_v15 }
  0x21   :  { %385 = vmatpush3.msra.mxu0 %v66_v15  ;;  %441 = vmatpush3.msra.mxu1 %v66_v15 }
  0x22   :  { %386 = vmatprep.mubr.f32.mxu0 %v50_v16  ;;  %398 = vmatprep.mubr.f32.mxu1 %v58_v17 }
  0x23   :  { %387 = vmatmul.mubr.f32.vlgmr.msra.gmra.mxu0 %v51_v18  ;;  %399 = vmatmul.mubr.f32.vlgmr.msra.gmra.mxu1 %v59_v19 }
  0x24   :  { %389 = vmatprep.mubr.f32.mxu0 %v52_v20  ;;  %401 = vmatprep.mubr.f32.mxu1 %v60_v21 }
  0x27   :  { %390 = vmatmul.mubr.f32.gmra.mxu0 %v53_v22  ;;  %402 = vmatmul.mubr.f32.gmra.mxu1 %v61_v23 }
  0x28   :  { %392 = vmatprep.mubr.f32.mxu0 %v54_v24  ;;  %404 = vmatprep.mubr.f32.mxu1 %v62_v25 }
  0x2b   :  { %393 = vmatmul.mubr.f32.gmra.mxu0 %v55_v26  ;;  %405 = vmatmul.mubr.f32.gmra.mxu1 %v63_v27 }
  0x2c   :  { %395 = vmatprep.mubr.f32.mxu0 %v56_v28  ;;  %407 = vmatprep.mubr.f32.mxu1 %v64_v29 }
  0x2f   :  { %396 = vmatmul.mubr.f32.gmra.mxu0 %v57_v30  ;;  %408 = vmatmul.mubr.f32.gmra.mxu1 %v65_v31 }
  0xe3   :  { %v388_v33 = vpop.f32.mrf.mxu0  ;;  %v400_v34 = vpop.f32.mrf.mxu1 }
  0xe4   :  { %v286_v35 = vadd.f32 %v388_v33, %v321_v32  ;;  %v294_v36 = vadd.f32 %v400_v34, %v321_v32 }
  0xe5   :  { %v148_v37 = vpop.f32.mrf.mxu0  ;;  %v188_v38 = vpop.f32.mrf.mxu1 }
  0xe6   :  { %302 = vst [vmem:[%s612_s3 + $0x8] sm:$0xff] %v286_v35  ;;  %310 = vst [vmem:[%s612_s3 + $0x48] sm:$0xff] %v294_v36  ;;  %v285_v39 = vadd.f32 %v321_v32, %v148_v37  ;;  %v293_v40 = vadd.f32 %v321_v32, %v188_v38 }
  0xe7   :  { %v391_v41 = vpop.f32.mrf.mxu0  ;;  %v403_v42 = vpop.f32.mrf.mxu1 }
  0xe8   :  { %301 = vst [vmem:[%s612_s3] sm:$0xff] %v285_v39  ;;  %309 = vst [vmem:[%s612_s3 + $0x40] sm:$0xff] %v293_v40  ;;  %v288_v43 = vadd.f32 %v391_v41, %v321_v32  ;;  %v296_v44 = vadd.f32 %v403_v42, %v321_v32 }
  0xe9   :  { %v158_v45 = vpop.f32.mrf.mxu0  ;;  %v198_v46 = vpop.f32.mrf.mxu1 }
  0xea   :  { %304 = vst [vmem:[%s612_s3 + $0x18] sm:$0xff] %v288_v43  ;;  %312 = vst [vmem:[%s612_s3 + $0x58] sm:$0xff] %v296_v44  ;;  %v287_v47 = vadd.f32 %v321_v32, %v158_v45  ;;  %v295_v48 = vadd.f32 %v321_v32, %v198_v46 }
  0xeb   :  { %v394_v49 = vpop.f32.mrf.mxu0  ;;  %v406_v50 = vpop.f32.mrf.mxu1 }
  0xec   :  { %303 = vst [vmem:[%s612_s3 + $0x10] sm:$0xff] %v287_v47  ;;  %311 = vst [vmem:[%s612_s3 + $0x50] sm:$0xff] %v295_v48  ;;  %v290_v51 = vadd.f32 %v394_v49, %v321_v32  ;;  %v298_v52 = vadd.f32 %v406_v50, %v321_v32 }
  0xed   :  { %v168_v53 = vpop.f32.mrf.mxu0  ;;  %v208_v54 = vpop.f32.mrf.mxu1 }
  0xee   :  { %306 = vst [vmem:[%s612_s3 + $0x28] sm:$0xff] %v290_v51  ;;  %314 = vst [vmem:[%s612_s3 + $0x68] sm:$0xff] %v298_v52  ;;  %v289_v55 = vadd.f32 %v321_v32, %v168_v53  ;;  %v297_v56 = vadd.f32 %v321_v32, %v208_v54 }
  0xef   :  { %v397_v57 = vpop.f32.mrf.mxu0  ;;  %v409_v58 = vpop.f32.mrf.mxu1 }
  0xf0   :  { %305 = vst [vmem:[%s612_s3 + $0x20] sm:$0xff] %v289_v55  ;;  %313 = vst [vmem:[%s612_s3 + $0x60] sm:$0xff] %v297_v56  ;;  %v292_v59 = vadd.f32 %v397_v57, %v321_v32  ;;  %v300_v60 = vadd.f32 %v409_v58, %v321_v32 }
  0xf1   :  { %v178_v61 = vpop.f32.mrf.mxu0  ;;  %v218_v62 = vpop.f32.mrf.mxu1 }
  0xf2   :  { %308 = vst [vmem:[%s612_s3 + $0x38] sm:$0xff] %v292_v59  ;;  %316 = vst [vmem:[%s612_s3 + $0x78] sm:$0xff] %v300_v60  ;;  %v291_v63 = vadd.f32 %v321_v32, %v178_v61  ;;  %v299_v0 = vadd.f32 %v321_v32, %v218_v62 }
  0xf4   :  { %307 = vst [vmem:[%s612_s3 + $0x30] sm:$0xff] %v291_v63  ;;  %315 = vst [vmem:[%s612_s3 + $0x70] sm:$0xff] %v299_v0 }

</bundles_post_ra>
